<compile_context>
chip_gen: v7x
topology: tpu7x:2x2x1
jax: 0.10.0
libtpu: 0.0.40
codegen_flags: <defaults>
</compile_context>

<pallas_src>
import math

import jax
import jax.numpy as jnp
from jax.experimental import pallas as pl
from jax.experimental.pallas import tpu as pltpu

_HALF_LOG_2PI = 0.5 * math.log(2.0 * math.pi)
# Target ~2 MiB (f32-equivalent element count) per input block:
# 3 inputs x 2 pipeline buffers x 2 MiB = 12 MiB, inside every chip's scoped VMEM.
_TARGET_BLOCK_BYTES = 2 * 1024 * 1024


def _lognorm_kernel(scores_ref, std_ref, targets_ref, out_ref, acc_ref):
    i = pl.program_id(1)

    @pl.when(i == 0)
    def _():
        acc_ref[...] = jnp.zeros_like(acc_ref)

    s = scores_ref[...].astype(jnp.float32)
    std = std_ref[...].astype(jnp.float32)
    t = targets_ref[...].astype(jnp.float32)

    log_s = jnp.log(s)
    inv_std = pl.reciprocal(std, approx=False)
    # 0.5*log(std * s^2) == 0.5*log(std) + log(s)   (s > 0, as in the reference)
    # The 0.5*log(2*pi) constant is added once in the wrapper.
    contrib = 0.5 * jnp.log(std) + log_s + jnp.square(log_s - t) * (0.5 * inv_std)

    # Sublane-only partial reduction; the cross-lane reduce happens in the wrapper.
    acc_ref[...] += jnp.sum(contrib, axis=0, keepdims=True)

    @pl.when(i == pl.num_programs(1) - 1)
    def _():
        out_ref[0] = acc_ref[...]


def _choose_block_rows(m, n):
    """Largest row-block that tiles M evenly, ~2 MiB of f32 elements per block."""
    target = max(8, _TARGET_BLOCK_BYTES // (n * 4))
    if m <= target:
        return m
    best = None
    r = 8
    while r <= target:
        if m % r == 0:
            best = r
        r += 8
    if best is None:
        # TODO(synk): no multiple-of-8 divisor <= target; fall back to whole-array
        # block (large VMEM) rather than a remainder/masking path.
        return m
    return best


def lognorm_loss(scores, std_scores, targets, *, block_rows=None):
    """Pallas implementation of Lognorm.forward.

    The `gpu` argument of the PyTorch module (device moves) and the in-forward
    print() are dropped; the returned value matches torch.mean(mse).
    """
    assert scores.shape == std_scores.shape == targets.shape
    assert scores.ndim == 2
    M, N = scores.shape

    if block_rows is None:
        block_rows = _choose_block_rows(M, N)
    assert M % block_rows == 0, "batch dim must tile evenly"
    assert block_rows == M or block_rows % 8 == 0, "sub-blocks must be sublane-aligned"

    num_blocks = M // block_rows
    # 2-way outer split (parallel axis) so v7x can use both TensorCores.
    num_splits = 2 if (num_blocks >= 2 and num_blocks % 2 == 0) else 1
    bps = num_blocks // num_splits  # blocks per split

    in_spec = pl.BlockSpec((block_rows, N),
                           lambda c, i, _bps=bps: (c * _bps + i, 0))

    partials = pl.pallas_call(
        _lognorm_kernel,
        out_shape=jax.ShapeDtypeStruct((num_splits, 1, N), jnp.float32),
        grid_spec=pltpu.PrefetchScalarGridSpec(
            num_scalar_prefetch=0,
            grid=(num_splits, bps),
            in_specs=[in_spec, in_spec, in_spec],
            out_specs=pl.BlockSpec((1, 1, N), lambda c, i: (c, 0, 0)),
            scratch_shapes=[pltpu.VMEM((1, N), jnp.float32)],
        ),
        compiler_params=pltpu.CompilerParams(
            dimension_semantics=("parallel", "arbitrary"),
            vmem_limit_bytes=32 * 1024 * 1024,
        ),
    )(scores, std_scores, targets)

    total = jnp.sum(partials, dtype=jnp.float32)
    return total / jnp.float32(M * N) + jnp.float32(_HALF_LOG_2PI)


def _lognorm_ref(scores, std_scores, targets):
    scores = scores.astype(jnp.float32)
    std_scores = std_scores.astype(jnp.float32)
    targets = targets.astype(jnp.float32)
    two_pi = jnp.float32(2.0 * math.pi)
    mse = (0.5 * jnp.log(two_pi)
           + 0.5 * jnp.log(std_scores * scores ** 2)
           + jnp.square(jnp.log(scores) - targets) / (2.0 * std_scores))
    return jnp.mean(mse)


if __name__ == "__main__":
    key = jax.random.PRNGKey(0)
    k1, k2, k3 = jax.random.split(key, 3)

    # Small shapes consistent with (batch, list_size) ranking inputs.
    batch, list_size = 16, 128
    # scores and std_scores must be positive (they feed log / division).
    scores = jnp.exp(jax.random.normal(k1, (batch, list_size), jnp.float32) * 0.5)
    std_scores = jnp.exp(jax.random.normal(k2, (batch, list_size), jnp.float32) * 0.3)
    targets = jax.random.normal(k3, (batch, list_size), jnp.float32)

    # Single-block path (whole array fits one tile at this size).
    out = jax.block_until_ready(lognorm_loss(scores, std_scores, targets))
    ref = _lognorm_ref(scores, std_scores, targets)
    assert jnp.allclose(out, ref, rtol=1e-5, atol=1e-5), (out, ref)

    # Multi-block + 2-way parallel-split path (forced small block for coverage).
    batch2 = 32
    s2 = jnp.exp(jax.random.normal(k1, (batch2, list_size), jnp.float32) * 0.5)
    std2 = jnp.exp(jax.random.normal(k2, (batch2, list_size), jnp.float32) * 0.3)
    t2 = jax.random.normal(k3, (batch2, list_size), jnp.float32)
    out2 = jax.block_until_ready(lognorm_loss(s2, std2, t2, block_rows=8))
    ref2 = _lognorm_ref(s2, std2, t2)
    assert jnp.allclose(out2, ref2, rtol=1e-5, atol=1e-5), (out2, ref2)

    # bf16 streaming smoke test (inputs stay bf16 on the wire, f32 math inside).
    out_bf16 = jax.block_until_ready(
        lognorm_loss(scores.astype(jnp.bfloat16),
                     std_scores.astype(jnp.bfloat16),
                     targets.astype(jnp.bfloat16)))
    assert bool(jnp.isfinite(out_bf16)), out_bf16

    print("KERNEL_OK")
</pallas_src>

<mosaic_0001>
module attributes {stable_mosaic.version = 11 : i64} {
  func.func @_lognorm_kernel(%arg0: i32, %arg1: i32, %arg2: memref<16x128xf32, #tpu.memory_space<vmem>>, %arg3: memref<16x128xf32, #tpu.memory_space<vmem>>, %arg4: memref<16x128xf32, #tpu.memory_space<vmem>>, %arg5: memref<1x1x128xf32, #tpu.memory_space<vmem>>, %arg6: memref<1x128xf32, #tpu.memory_space<vmem>>) attributes {dimension_semantics = [#tpu.dimension_semantics<parallel>, #tpu.dimension_semantics<arbitrary>], iteration_bounds = array<i64: 1, 1>, scalar_prefetch = 0 : i64, scratch_operands = 1 : i64, tpu.core_type = #tpu.core_type<tc>, window_params = [{transform_indices = @transform_0, window_bounds = array<i64: 16, 128>}, {transform_indices = @transform_1, window_bounds = array<i64: 16, 128>}, {transform_indices = @transform_2, window_bounds = array<i64: 16, 128>}, {transform_indices = @transform_3, window_bounds = array<i64: 1, 1, 128>}]} {
    %c0_i32 = arith.constant 0 : i32
    %0 = arith.cmpi eq, %arg1, %c0_i32 : i32
    %1 = arith.extui %0 : i1 to i32
    %c0_i32_0 = arith.constant 0 : i32
    %2 = arith.cmpi ne, %1, %c0_i32_0 : i32
    scf.if %2 {
      %cst_14 = arith.constant 0.000000e+00 : f32
      %26 = vector.broadcast %cst_14 : f32 to vector<1x128xf32>
      %c0_15 = arith.constant 0 : index
      %c0_16 = arith.constant 0 : index
      %27 = vector.load %arg6[%c0_15, %c0_16] : memref<1x128xf32, #tpu.memory_space<vmem>>, vector<1x128xf32>
      tpu.vector_store %arg6[%c0_15, %c0_16], %26 {strides = array<i32>} : memref<1x128xf32, #tpu.memory_space<vmem>>, vector<1x128xf32>,
    } else {
    }
    %c0 = arith.constant 0 : index
    %c0_1 = arith.constant 0 : index
    %3 = vector.load %arg2[%c0, %c0_1] : memref<16x128xf32, #tpu.memory_space<vmem>>, vector<16x128xf32>
    %c0_2 = arith.constant 0 : index
    %c0_3 = arith.constant 0 : index
    %4 = vector.load %arg3[%c0_2, %c0_3] : memref<16x128xf32, #tpu.memory_space<vmem>>, vector<16x128xf32>
    %c0_4 = arith.constant 0 : index
    %c0_5 = arith.constant 0 : index
    %5 = vector.load %arg4[%c0_4, %c0_5] : memref<16x128xf32, #tpu.memory_space<vmem>>, vector<16x128xf32>
    %6 = math.log %3 : vector<16x128xf32>
    %7 = tpu.reciprocal %4 : vector<16x128xf32> -> vector<16x128xf32>
    %8 = math.log %4 : vector<16x128xf32>
    %cst = arith.constant 5.000000e-01 : f32
    %9 = vector.broadcast %cst : f32 to vector<16x128xf32>
    %10 = arith.mulf %9, %8 : vector<16x128xf32>
    %11 = arith.addf %10, %6 : vector<16x128xf32>
    %12 = arith.subf %6, %5 : vector<16x128xf32>
    %13 = arith.mulf %12, %12 : vector<16x128xf32>
    %cst_6 = arith.constant 5.000000e-01 : f32
    %14 = vector.broadcast %cst_6 : f32 to vector<16x128xf32>
    %15 = arith.mulf %14, %7 : vector<16x128xf32>
    %16 = arith.mulf %13, %15 : vector<16x128xf32>
    %17 = arith.addf %11, %16 : vector<16x128xf32>
    %c0_7 = arith.constant 0 : index
    %c0_8 = arith.constant 0 : index
    %18 = vector.load %arg6[%c0_7, %c0_8] : memref<1x128xf32, #tpu.memory_space<vmem>>, vector<1x128xf32>
    %cst_9 = arith.constant dense<0.000000e+00> : vector<128xf32>
    %19 = vector.multi_reduction <add>, %17, %cst_9 [0] : vector<16x128xf32> to vector<128xf32>
    %20 = vector.shape_cast %19 : vector<128xf32> to vector<1x128xf32>
    %21 = arith.addf %18, %20 : vector<1x128xf32>
    %c0_10 = arith.constant 0 : index
    %c0_11 = arith.constant 0 : index
    %22 = vector.load %arg6[%c0_10, %c0_11] : memref<1x128xf32, #tpu.memory_space<vmem>>, vector<1x128xf32>
    tpu.vector_store %arg6[%c0_10, %c0_11], %21 {strides = array<i32>} : memref<1x128xf32, #tpu.memory_space<vmem>>, vector<1x128xf32>,
    %c0_i32_12 = arith.constant 0 : i32
    %23 = arith.cmpi eq, %arg1, %c0_i32_12 : i32
    %24 = arith.extui %23 : i1 to i32
    %c0_i32_13 = arith.constant 0 : i32
    %25 = arith.cmpi ne, %24, %c0_i32_13 : i32
    scf.if %25 {
      %c0_14 = arith.constant 0 : index
      %c0_15 = arith.constant 0 : index
      %26 = vector.load %arg6[%c0_14, %c0_15] : memref<1x128xf32, #tpu.memory_space<vmem>>, vector<1x128xf32>
      %c0_16 = arith.constant 0 : index
      %c0_17 = arith.constant 0 : index
      %c0_18 = arith.constant 0 : index
      %27 = vector.load %arg5[%c0_16, %c0_17, %c0_18] : memref<1x1x128xf32, #tpu.memory_space<vmem>>, vector<1x1x128xf32>
      %28 = vector.shape_cast %27 : vector<1x1x128xf32> to vector<1x128xf32>
      %29 = vector.shape_cast %26 : vector<1x128xf32> to vector<1x1x128xf32>
      tpu.vector_store %arg5[%c0_16, %c0_17, %c0_18], %29 {strides = array<i32>} : memref<1x1x128xf32, #tpu.memory_space<vmem>>, vector<1x1x128xf32>,
    } else {
    }
    return
  }
  func.func @transform_0(%arg0: i32, %arg1: i32) -> (i32, i32) {
    %c1_i32 = arith.constant 1 : i32
    %0 = arith.muli %arg0, %c1_i32 : i32
    %1 = arith.addi %0, %arg1 : i32
    %c0_i32 = arith.constant 0 : i32
    %c0_i32_0 = arith.constant 0 : i32
    return %1, %c0_i32 : i32, i32
  }
  func.func @transform_1(%arg0: i32, %arg1: i32) -> (i32, i32) {
    %c1_i32 = arith.constant 1 : i32
    %0 = arith.muli %arg0, %c1_i32 : i32
    %1 = arith.addi %0, %arg1 : i32
    %c0_i32 = arith.constant 0 : i32
    %c0_i32_0 = arith.constant 0 : i32
    return %1, %c0_i32 : i32, i32
  }
  func.func @transform_2(%arg0: i32, %arg1: i32) -> (i32, i32) {
    %c1_i32 = arith.constant 1 : i32
    %0 = arith.muli %arg0, %c1_i32 : i32
    %1 = arith.addi %0, %arg1 : i32
    %c0_i32 = arith.constant 0 : i32
    %c0_i32_0 = arith.constant 0 : i32
    return %1, %c0_i32 : i32, i32
  }
  func.func @transform_3(%arg0: i32, %arg1: i32) -> (i32, i32, i32) {
    %c0_i32 = arith.constant 0 : i32
    %c0_i32_0 = arith.constant 0 : i32
    %c0_i32_1 = arith.constant 0 : i32
    return %arg0, %c0_i32, %c0_i32_0 : i32, i32, i32
  }
}

</mosaic_0001>

<bundles_post_ra>
// kernel: tpu_custom_call.1
= control target key start
LH: loop header
LB: loop body
LE: loop exit
PB: predicated region body
PF: predicated region fallthrough
CT: control target
= control target key end

     0   :  { %8 = vsyncpa [#allocation4], 0  ;;  %s344_s0 = inlined_call_operand.hbm [shape: f32[16,128], index: 0, kind: input, shape index: {}]   ;;  %s345_s1 = inlined_call_operand.hbm [shape: f32[16,128], index: 1, kind: input, shape index: {}]   ;;  %s346_s2 = inlined_call_operand.hbm [shape: f32[16,128], index: 2, kind: input, shape index: {}]   ;;  %s347_s3 = inlined_call_operand.hbm [shape: f32[1,1,128], index: 3, kind: output, shape index: {}]  }
   0x1   :  { %9 = vsyncpa [#allocation7], 0 }
   0x2   :  { %10 = vsyncpa [#allocation5], 0  ;;  %s253_s12 = smov [#allocation6]   ;;  %s254_s14 = smov [#allocation3]  }
   0x3   :  { %s36_s13 = sshll.u32 %s253_s12, 4  ;;  %s20_s15 = sshll.u32 %s254_s14, 4  ;;  %s37_s13 = int_to_ptr.vmem [resolvable:$true] %s36_s13  ;;  %s280_s15 = int_to_ptr.vmem [resolvable:$true] %s20_s15 }
   0x4   :  { %s159_s18 = scalar_lea.hbm %s345_s1, 256 }
   0x5   :  { %p160_p0 = scmp.ne.s32.totalorder %s345_s1, %s159_s18  ;;  %p163_p1 = scmp.lt.u32.totalorder %s159_s18, %s345_s1 }
   0x7   :  { %p165_p2 = pnand %p163_p1, %p160_p0 }
   0x9   :  { %168 = shalt.err (!%p165_p2)
}
   0xa   :  { %s169_s23 = scalar_lea.vmem %s37_s13, 256  ;;  %p174_p4 = scmp.lt.s32.totalorder %s37_s13, %s37_s13 }
   0xb   :  { %p170_p3 = scmp.ne.s32.totalorder %s37_s13, %s169_s23  ;;  %p175_p5 = scmp.lt.s32.totalorder %s169_s23, %s169_s23 }
   0xd   :  { %p176_p6 = por %p175_p5, %p174_p4 }
   0xf   :  { %p177_p7 = pnand %p176_p6, %p170_p3 }
  0x11   :  { %180 = shalt.err (!%p177_p7)
}
  0x12   :  { %s255_s24 = smov 128   ;;  %s256_s25 = smov 8  }
  0x13   :  { %42 = dma.hbm_to_vmem [thread:$0]  %s345_s1, 256, %s37_s13, [#allocation7], %s255_s24, %s255_s24, %s256_s25  }
  0x14   :  { %s181_s30 = scalar_lea.hbm %s344_s0, 256 }
  0x15   :  { %p182_p8 = scmp.ne.s32.totalorder %s344_s0, %s181_s30  ;;  %p185_p9 = scmp.lt.u32.totalorder %s181_s30, %s344_s0 }
  0x17   :  { %p187_p10 = pnand %p185_p9, %p182_p8 }
  0x19   :  { %190 = shalt.err (!%p187_p10)
}
  0x1a   :  { %s191_s8 = scalar_lea.vmem %s280_s15, 256  ;;  %p196_p12 = scmp.lt.s32.totalorder %s280_s15, %s280_s15 }
  0x1b   :  { %p192_p11 = scmp.ne.s32.totalorder %s280_s15, %s191_s8  ;;  %p197_p13 = scmp.lt.s32.totalorder %s191_s8, %s191_s8 }
  0x1d   :  { %p198_p0 = por %p197_p13, %p196_p12 }
  0x1f   :  { %p199_p1 = pnand %p198_p0, %p192_p11 }
  0x21   :  { %202 = shalt.err (!%p199_p1)
}
  0x22   :  { %26 = dma.hbm_to_vmem [thread:$0]  %s344_s0, 256, %s280_s15, [#allocation4], %s255_s24, %s255_s24, %s256_s25  }
  0x23   :  { %s257_s10 = smov [#allocation8]   ;;  %s203_s14 = scalar_lea.hbm %s346_s2, 256 }
  0x24   :  { %s52_s11 = sshll.u32 %s257_s10, 4  ;;  %p204_p2 = scmp.ne.s32.totalorder %s346_s2, %s203_s14  ;;  %s53_s11 = int_to_ptr.vmem [resolvable:$true] %s52_s11 }
  0x25   :  { %p207_p3 = scmp.lt.u32.totalorder %s203_s14, %s346_s2 }
  0x27   :  { %p209_p4 = pnand %p207_p3, %p204_p2 }
  0x29   :  { %212 = shalt.err (!%p209_p4)
}
  0x2a   :  { %s213_s20 = scalar_lea.vmem %s53_s11, 256  ;;  %p218_p6 = scmp.lt.s32.totalorder %s53_s11, %s53_s11 }
  0x2b   :  { %p214_p5 = scmp.ne.s32.totalorder %s53_s11, %s213_s20  ;;  %p219_p7 = scmp.lt.s32.totalorder %s213_s20, %s213_s20 }
  0x2d   :  { %p220_p8 = por %p219_p7, %p218_p6 }
  0x2f   :  { %p221_p9 = pnand %p220_p8, %p214_p5 }
  0x31   :  { %224 = shalt.err (!%p221_p9)
}
  0x32   :  { %58 = dma.hbm_to_vmem [thread:$0]  %s346_s2, 256, %s53_s11, [#allocation7], %s255_s24, %s255_s24, %s256_s25  }
  0x33   :  { %247 = dma.done.wait [#allocation4], 256  }
  0x34   :  { %248 = vsyncadd [#allocation4], 4294967040 }
  0x35   :  { %249 = dma.done.wait [#allocation7], 512  }
  0x36   :  { %250 = vsyncadd [#allocation7], 4294966784  ;;  %v258_v0 = vmov 0.0   ;;  %v79_v1 = vld [vmem:[#allocation3] sm:$0xff]  ;;  %v80_v2 = vld [vmem:[#allocation3 + $0x8] sm:$0xff]  ;;  %s259_s2 = smov [#allocation9]  }
  0x37   :  { %78 = vst [vmem:[#allocation2] sm:$0x1] %v258_v0  ;;  %147 = vlog2.f32 %v79_v1  ;;  %v81_v3 = vld [vmem:[#allocation6] sm:$0xff]  ;;  %v82_v4 = vld [vmem:[#allocation6 + $0x8] sm:$0xff]  ;;  %v83_v6 = vld [vmem:[#allocation8] sm:$0xff]  ;;  %s130_s21 = sshll.u32 %s259_s2, 4  ;;  %s131_s21 = int_to_ptr.vmem [resolvable:$true] %s130_s21 }
  0x38   :  { %149 = vlog2.f32 %v80_v2  ;;  %v84_v8 = vld [vmem:[#allocation8 + $0x8] sm:$0xff]  ;;  %s225_s22 = scalar_lea.vmem %s131_s21, 16  ;;  %s229_s23 = scalar_lea.vmem %s131_s21, 32 }
  0x39   :  { %151 = vrcp.f32 %v81_v3  ;;  %p226_p10 = scmp.ne.s32.totalorder %s131_s21, %s225_s22  ;;  %p230_p11 = scmp.lt.s32.totalorder %s131_s21, %s131_s21 }
  0x3a   :  { %153 = vrcp.f32 %v82_v4  ;;  %p231_p12 = scmp.lt.s32.totalorder %s229_s23, %s225_s22 }
  0x3b   :  { %155 = vlog2.f32 %v81_v3 }
  0x3c   :  { %157 = vlog2.f32 %v82_v4  ;;  %p232_p13 = por %p231_p12, %p230_p11 }
  0x3e   :  { %v109_v37 = vld [vmem:[#allocation2] sm:$0x1]  ;;  %p233_p0 = pnand %p232_p13, %p226_p10 }
  0x41   :  { %v148_v5 = vpop.eup %147 }
  0x42   :  { %v150_v7 = vpop.eup %149  ;;  %v86_v9 = vmul.f32 0.6931472, %v148_v5 }
  0x43   :  { %v152_v10 = vpop.eup %151  ;;  %v88_v11 = vmul.f32 0.6931472, %v150_v7 }
  0x44   :  { %v154_v12 = vpop.eup %153  ;;  %v99_v13 = vsub.f32 %v86_v9, %v83_v6  ;;  %v103_v14 = vmul.f32 0.5, %v152_v10 }
  0x45   :  { %v156_v15 = vpop.eup %155  ;;  %v100_v16 = vsub.f32 %v88_v11, %v84_v8  ;;  %v104_v17 = vmul.f32 0.5, %v154_v12 }
  0x46   :  { %v158_v18 = vpop.eup %157  ;;  %v92_v19 = vmul.f32 0.6931472, %v156_v15  ;;  %v101_v20 = vmul.f32 %v99_v13, %v99_v13 }
  0x47   :  { %v94_v21 = vmul.f32 0.6931472, %v158_v18  ;;  %v102_v22 = vmul.f32 %v100_v16, %v100_v16 }
  0x48   :  { %v95_v23 = vmul.f32 0.5, %v92_v19  ;;  %v105_v24 = vmul.f32 %v103_v14, %v101_v20 }
  0x49   :  { %v96_v25 = vmul.f32 0.5, %v94_v21  ;;  %v106_v26 = vmul.f32 %v104_v17, %v102_v22 }
  0x4a   :  { %v97_v27 = vadd.f32 %v95_v23, %v86_v9 }
  0x4b   :  { %v98_v28 = vadd.f32 %v96_v25, %v88_v11 }
  0x4c   :  { %v107_v29 = vadd.f32 %v105_v24, %v97_v27 }
  0x4d   :  { %v108_v30 = vadd.f32 %v106_v26, %v98_v28 }
  0x4f   :  { %v110_v31 = vadd.f32 %v108_v30, %v107_v29 }
  0x51   :  { %v111_v32 = vrot.slane %v110_v31, 4 }
  0x53   :  { %v112_v33 = vadd.f32 %v111_v32, %v110_v31 }
  0x55   :  { %v113_v34 = vrot.slane %v112_v33, 2 }
  0x57   :  { %v114_v35 = vadd.f32 %v113_v34, %v112_v33 }
  0x59   :  { %v115_v36 = vrot.slane %v114_v35, 1 }
  0x5b   :  { %v116_v38 = vadd.f32 %v115_v36, %v114_v35 }
  0x5d   :  { %v117_v39 = vadd.f32 %v116_v38, %v109_v37 }
  0x5f   :  { %118 = vst [vmem:[#allocation2] sm:$0x1] %v117_v39 }
  0x66   :  { %v122_v40 = vld [vmem:[#allocation2] sm:$0x1] }
  0x67   :  { %123 = vst [vmem:[#allocation9] sm:$0x1] %v122_v40 }
  0x68   :  { %236 = shalt.err (!%p233_p0)
}
  0x69   :  { %s237_s26 = scalar_lea.hbm %s347_s3, 16 }
  0x6a   :  { %p238_p1 = scmp.ne.s32.totalorder %s347_s3, %s237_s26  ;;  %p241_p2 = scmp.lt.u32.totalorder %s237_s26, %s347_s3 }
  0x6c   :  { %p243_p3 = pnand %p241_p2, %p238_p1 }
  0x6e   :  { %246 = shalt.err (!%p243_p3)
}
  0x6f   :  { %133 = dma.vmem_to_hbm [thread:$0]  %s131_s21, 16, %s347_s3, [#allocation5]  }
  0x70   :  { %251 = dma.done.wait [#allocation5], 16  }
  0x71   :  { %252 = vsyncadd [#allocation5], 4294967280 }
  0x72   :  { %137 = vsyncpa [#allocation4], 1 }
  0x73   :  { %138 = vsyncpa [#allocation7], 1 }
  0x74   :  { %139 = vsyncpa [#allocation5], 1 }

</bundles_post_ra>
